<compile_context>
chip_gen: v7x
topology: tpu7x:2x2x1
jax: 0.10.0
libtpu: 0.0.40
codegen_flags: <defaults>
</compile_context>

<pallas_src>
import functools

import jax
import jax.numpy as jnp
from jax.experimental import pallas as pl
from jax.experimental.pallas import tpu as pltpu

_LANE = 128
_SUBLANE = 8
_VMEM_BUDGET = 24 << 20   # target for the double-buffered block working set
_VMEM_LIMIT = 48 << 20    # explicit scoped-VMEM limit (fits all generations)


def _round_up(v, m):
    return (v + m - 1) // m * m


def _linear_kernel(*refs, use_bias, multi_k, use_scratch):
    """Canonical (tm,tk)x(tk,tn) MXU contraction; bias added once at writeback."""
    if use_scratch:
        acc_scratch = refs[-1]
        refs = refs[:-1]
    if use_bias:
        x_ref, w_ref, b_ref, o_ref = refs
    else:
        (x_ref, w_ref, o_ref), b_ref = refs, None

    part = jnp.dot(x_ref[...], w_ref[...], preferred_element_type=jnp.float32)

    if not multi_k:
        # Single grid step over K: write the output directly, no accumulator.
        if use_bias:
            part = part + b_ref[...].astype(jnp.float32)
        o_ref[...] = part.astype(o_ref.dtype)
        return

    # Multi-K: accumulate in-place in the resident f32 output block when
    # possible; fall back to an f32 VMEM scratch for low-precision outputs.
    acc = acc_scratch if use_scratch else o_ref
    k = pl.program_id(2)

    @pl.when(k == 0)
    def _init():
        acc[...] = jnp.zeros_like(acc)

    acc[...] += part

    if use_scratch or use_bias:
        @pl.when(k == pl.num_programs(2) - 1)
        def _writeback():
            out = acc[...]
            if use_bias:
                out = out + b_ref[...].astype(jnp.float32)
            o_ref[...] = out.astype(o_ref.dtype)


def _plan_tiles(batch, k_dim, n_dim, in_bytes, out_bytes):
    """Pick (tm, tn, tk): lane/sublane aligned, collapse K when it fits VMEM."""
    tm = min(_round_up(batch, _SUBLANE), 512)
    tn = min(_round_up(n_dim, _LANE), 256)
    k_full = _round_up(k_dim, _LANE)

    def working_set(tk):
        # double-buffered x, w, out blocks (bias block is negligible)
        return 2 * (tm * tk + tk * tn) * in_bytes + 2 * tm * tn * out_bytes

    if working_set(k_full) <= _VMEM_BUDGET:
        return tm, tn, k_full                       # single K step
    tk = _LANE
    for cand in (4096, 2048, 1024, 512, 256, 128):
        if working_set(cand) <= _VMEM_BUDGET:
            tk = cand
            break
    return tm, tn, tk


@functools.partial(jax.jit, static_argnames=("use_bias", "compute_dtype", "tk_override"))
def linear_regression_forward(x, weight, bias=None, *, use_bias=False,
                              compute_dtype=None, tk_override=None):
    """Pallas equivalent of LinearRegression.forward.

    x:      (B, INPUT_SIZE)
    weight: (OUTPUT_SIZE, INPUT_SIZE)   -- PyTorch nn.Linear layout
    bias:   (OUTPUT_SIZE,) or None
    """
    B, in_size = x.shape
    out_size, in_size_w = weight.shape
    assert in_size == in_size_w, "weight must be (OUTPUT_SIZE, INPUT_SIZE)"

    out_dtype = x.dtype
    cdt = jnp.dtype(compute_dtype) if compute_dtype is not None else jnp.dtype(x.dtype)

    # One-time transpose to (IN, OUT): keeps the kernel contraction canonical.
    w_t = weight.T.astype(cdt)
    xc = x.astype(cdt)

    tm, tn, tk = _plan_tiles(B, in_size, out_size, cdt.itemsize,
                             jnp.dtype(out_dtype).itemsize)
    if tk_override is not None:
        tk = int(tk_override)

    m_pad = _round_up(B, tm)
    n_pad = _round_up(out_size, tn)
    k_pad = _round_up(in_size, tk)

    # Zero-pad: K padding contributes exact zeros; padded M/N is sliced off.
    xp = jnp.pad(xc, ((0, m_pad - B), (0, k_pad - in_size)))
    wp = jnp.pad(w_t, ((0, k_pad - in_size), (0, n_pad - out_size)))

    multi_k = (k_pad // tk) > 1
    out_is_f32 = jnp.dtype(out_dtype) == jnp.float32
    use_scratch = multi_k and not out_is_f32

    if multi_k:
        grid = (m_pad // tm, n_pad // tn, k_pad // tk)   # reduction axis last
        x_spec = pl.BlockSpec((tm, tk), lambda i, j, k: (i, k))
        w_spec = pl.BlockSpec((tk, tn), lambda i, j, k: (k, j))
        b_spec = pl.BlockSpec((1, tn), lambda i, j, k: (0, j))
        o_spec = pl.BlockSpec((tm, tn), lambda i, j, k: (i, j))
        dim_sem = ("parallel", "parallel", "arbitrary")
    else:
        grid = (m_pad // tm, n_pad // tn)
        x_spec = pl.BlockSpec((tm, tk), lambda i, j: (i, 0))
        w_spec = pl.BlockSpec((tk, tn), lambda i, j: (0, j))
        b_spec = pl.BlockSpec((1, tn), lambda i, j: (0, j))
        o_spec = pl.BlockSpec((tm, tn), lambda i, j: (i, j))
        dim_sem = ("parallel", "parallel")

    kernel = functools.partial(_linear_kernel, use_bias=use_bias,
                               multi_k=multi_k, use_scratch=use_scratch)

    in_specs = [x_spec, w_spec]
    operands = [xp, wp]
    if use_bias:
        bp = jnp.pad(bias.astype(jnp.float32).reshape(1, out_size),
                     ((0, 0), (0, n_pad - out_size)))
        in_specs.append(b_spec)
        operands.append(bp)

    scratch = [pltpu.VMEM((tm, tn), jnp.float32)] if use_scratch else []

    yp = pl.pallas_call(
        kernel,
        out_shape=jax.ShapeDtypeStruct((m_pad, n_pad), out_dtype),
        grid_spec=pltpu.PrefetchScalarGridSpec(
            num_scalar_prefetch=0,
            grid=grid,
            in_specs=in_specs,
            out_specs=o_spec,
            scratch_shapes=scratch,
        ),
        compiler_params=pltpu.CompilerParams(
            dimension_semantics=dim_sem,
            vmem_limit_bytes=_VMEM_LIMIT,
        ),
    )(*operands)

    return yp[:B, :out_size]


def init_linear_params(key, input_size, output_size, bias=False):
    """Deterministic init mirroring nn.Linear's default (uniform +/- 1/sqrt(fan_in))."""
    wkey, bkey = jax.random.split(key)
    bound = 1.0 / (input_size ** 0.5)
    weight = jax.random.uniform(
        wkey, (output_size, input_size), jnp.float32, minval=-bound, maxval=bound)
    b = (jax.random.uniform(bkey, (output_size,), jnp.float32, minval=-bound, maxval=bound)
         if bias else None)
    return weight, b


if __name__ == "__main__":
    # Small shapes consistent with the module; OUTPUT_SIZE=4 exercises the
    # pad-to-128 lane-dense output path.
    INPUT_SIZE = 32
    OUTPUT_SIZE = 4
    BATCH = 8

    key = jax.random.PRNGKey(0)
    xkey, pkey = jax.random.split(key)
    x = jax.random.normal(xkey, (BATCH, INPUT_SIZE), dtype=jnp.float32)
    weight, bias = init_linear_params(pkey, INPUT_SIZE, OUTPUT_SIZE, bias=True)

    # Module default: BIAS=False  (single-K, no accumulator, lane-padded N)
    y = jax.block_until_ready(linear_regression_forward(x, weight, use_bias=False))
    assert y.shape == (BATCH, OUTPUT_SIZE)
    assert jnp.allclose(y, x @ weight.T, atol=1e-4, rtol=1e-4)

    # BIAS=True configuration
    yb = jax.block_until_ready(
        linear_regression_forward(x, weight, bias, use_bias=True))
    assert jnp.allclose(yb, x @ weight.T + bias, atol=1e-4, rtol=1e-4)

    # Forced multi-K path: exercises in-place f32 accumulation in o_ref.
    INPUT_SIZE2, OUTPUT_SIZE2 = 256, 128
    x2 = jax.random.normal(xkey, (BATCH, INPUT_SIZE2), dtype=jnp.float32)
    w2, _ = init_linear_params(pkey, INPUT_SIZE2, OUTPUT_SIZE2, bias=False)
    y2 = jax.block_until_ready(
        linear_regression_forward(x2, w2, use_bias=False, tk_override=128))
    assert jnp.allclose(y2, x2 @ w2.T, atol=1e-4, rtol=1e-4)

    print("KERNEL_OK")
</pallas_src>

<mosaic_0001>
module attributes {stable_mosaic.version = 11 : i64} {
  func.func @_linear_kernel(%arg0: i32, %arg1: i32, %arg2: memref<8x128xf32, #tpu.memory_space<vmem>>, %arg3: memref<128x128xf32, #tpu.memory_space<vmem>>, %arg4: memref<8x128xf32, #tpu.memory_space<vmem>>) attributes {dimension_semantics = [#tpu.dimension_semantics<parallel>, #tpu.dimension_semantics<parallel>], iteration_bounds = array<i64: 1, 1>, scalar_prefetch = 0 : i64, scratch_operands = 0 : i64, tpu.core_type = #tpu.core_type<tc>, window_params = [{transform_indices = @transform_0, window_bounds = array<i64: 8, 128>}, {transform_indices = @transform_1, window_bounds = array<i64: 128, 128>}, {transform_indices = @transform_2, window_bounds = array<i64: 8, 128>}]} {
    %c0 = arith.constant 0 : index
    %c0_0 = arith.constant 0 : index
    %0 = vector.load %arg2[%c0, %c0_0] : memref<8x128xf32, #tpu.memory_space<vmem>>, vector<8x128xf32>
    %c0_1 = arith.constant 0 : index
    %c0_2 = arith.constant 0 : index
    %1 = vector.load %arg3[%c0_1, %c0_2] : memref<128x128xf32, #tpu.memory_space<vmem>>, vector<128x128xf32>
    %cst = arith.constant dense<0.000000e+00> : vector<8x128xf32>
    %2 = tpu.matmul %0, %1, %cst {dimension_numbers = #tpu.dot_dimension_numbers<[1], [0], [0], [1], [0, 0, 1, 1], [], []>} : vector<8x128xf32>, vector<128x128xf32>, vector<8x128xf32> -> vector<8x128xf32>
    %c0_3 = arith.constant 0 : index
    %c0_4 = arith.constant 0 : index
    %3 = vector.load %arg4[%c0_3, %c0_4] : memref<8x128xf32, #tpu.memory_space<vmem>>, vector<8x128xf32>
    tpu.vector_store %arg4[%c0_3, %c0_4], %2 {strides = array<i32>} : memref<8x128xf32, #tpu.memory_space<vmem>>, vector<8x128xf32>,
    return
  }
  func.func @transform_0(%arg0: i32, %arg1: i32) -> (i32, i32) {
    %c0_i32 = arith.constant 0 : i32
    %c0_i32_0 = arith.constant 0 : i32
    return %arg0, %c0_i32 : i32, i32
  }
  func.func @transform_1(%arg0: i32, %arg1: i32) -> (i32, i32) {
    %c0_i32 = arith.constant 0 : i32
    %c0_i32_0 = arith.constant 0 : i32
    return %c0_i32, %arg1 : i32, i32
  }
  func.func @transform_2(%arg0: i32, %arg1: i32) -> (i32, i32) {
    %c0_i32 = arith.constant 0 : i32
    return %arg0, %arg1 : i32, i32
  }
}

</mosaic_0001>

<bundles_post_ra>
// kernel: linear_regression_forward.1
= control target key start
LH: loop header
LB: loop body
LE: loop exit
PB: predicated region body
PF: predicated region fallthrough
CT: control target
= control target key end

     0   :  { %v182_v0 = vmov 0.0|0.0   ;;  %vm183_vm0 = vmmov 0   ;;  %v184_v4 = vmov 0.0   ;;  %s254_s1 = inlined_call_operand.vmem [shape: f32[128,128], index: 1, kind: input, shape index: {}]   ;;  %s255_s0 = inlined_call_operand.vmem [shape: f32[8,128], index: 0, kind: input, shape index: {}]   ;;  %s256_s2 = inlined_call_operand.vmem [shape: f32[8,128], index: 2, kind: output, shape index: {}]  }
   0x1   :  { %155 = vmatprep.subr.bf16.mxu0 %v182_v0  ;;  %v12_v1 = vld [vmem:[%s254_s1] sm:$0xff]  ;;  %v13_v2 = vld [vmem:[%s254_s1 + $0x8] sm:$0xff]  ;;  %v14_v3 = vld [vmem:[%s254_s1 + $0x10] sm:$0xff]  ;;  %152 = vmatprep.mubr.msk.f32.mxu0 %vm183_vm0, %v184_v4 }
   0x2   :  { %v156_v5 = vpack.c.bf16 %v13_v2, %v12_v1  ;;  %v15_v6 = vld [vmem:[%s254_s1 + $0x18] sm:$0xff]  ;;  %v16_v8 = vld [vmem:[%s254_s1 + $0x20] sm:$0xff]  ;;  %v17_v9 = vld [vmem:[%s254_s1 + $0x28] sm:$0xff] }
   0x3   :  { %v159_v7 = vpack.c.bf16 %v15_v6, %v14_v3  ;;  %v162_v10 = vpack.c.bf16 %v17_v9, %v16_v8  ;;  %v18_v11 = vld [vmem:[%s254_s1 + $0x30] sm:$0xff]  ;;  %v19_v12 = vld [vmem:[%s254_s1 + $0x38] sm:$0xff]  ;;  %v20_v14 = vld [vmem:[%s254_s1 + $0x40] sm:$0xff] }
   0x4   :  { %157 = vmatpush3.bf16.msra.mxu0 %v156_v5  ;;  %v165_v13 = vpack.c.bf16 %v19_v12, %v18_v11  ;;  %v21_v15 = vld [vmem:[%s254_s1 + $0x48] sm:$0xff]  ;;  %v22_v17 = vld [vmem:[%s254_s1 + $0x50] sm:$0xff]  ;;  %v23_v18 = vld [vmem:[%s254_s1 + $0x58] sm:$0xff] }
   0x5   :  { %158 = vmatprep.subr.bf16.mxu0 %v182_v0  ;;  %v168_v16 = vpack.c.bf16 %v21_v15, %v20_v14  ;;  %v171_v19 = vpack.c.bf16 %v23_v18, %v22_v17  ;;  %v24_v20 = vld [vmem:[%s254_s1 + $0x60] sm:$0xff]  ;;  %v25_v21 = vld [vmem:[%s254_s1 + $0x68] sm:$0xff]  ;;  %v26_v23 = vld [vmem:[%s254_s1 + $0x70] sm:$0xff] }
   0x6   :  { %v174_v22 = vpack.c.bf16 %v25_v21, %v24_v20  ;;  %v27_v24 = vld [vmem:[%s254_s1 + $0x78] sm:$0xff]  ;;  %v11_v26 = vld [vmem:[%s255_s0] sm:$0xff] }
   0x7   :  { %v177_v25 = vpack.c.bf16 %v27_v24, %v26_v23 }
   0x8   :  { %160 = vmatpush3.bf16.msra.mxu0 %v159_v7 }
   0x9   :  { %161 = vmatprep.subr.bf16.mxu0 %v182_v0 }
   0xc   :  { %163 = vmatpush3.bf16.msra.mxu0 %v162_v10 }
   0xd   :  { %164 = vmatprep.subr.bf16.mxu0 %v182_v0 }
  0x10   :  { %166 = vmatpush3.bf16.msra.mxu0 %v165_v13 }
  0x11   :  { %167 = vmatprep.subr.bf16.mxu0 %v182_v0 }
  0x14   :  { %169 = vmatpush3.bf16.msra.mxu0 %v168_v16 }
  0x15   :  { %170 = vmatprep.subr.bf16.mxu0 %v182_v0 }
  0x18   :  { %172 = vmatpush3.bf16.msra.mxu0 %v171_v19 }
  0x19   :  { %173 = vmatprep.subr.bf16.mxu0 %v182_v0 }
  0x1c   :  { %175 = vmatpush3.bf16.msra.mxu0 %v174_v22 }
  0x1d   :  { %176 = vmatprep.subr.bf16.mxu0 %v182_v0 }
  0x20   :  { %178 = vmatpush3.bf16.msra.mxu0 %v177_v25 }
  0x23   :  { %153 = vmatmul.mubr.f32.vlgmr.msra.gmra.mrb[0].mxu0 %v11_v26 }
  0xf6   :  { %v94_v27 = vpop.f32.mrb[0].mxu0 }
  0xf7   :  { %98 = vst [vmem:[%s256_s2] sm:$0xff] %v94_v27  ;;  %v154_v28 = vpop.f32.mrb[1].mxu0 }

</bundles_post_ra>
